<compile_context>
chip_gen: v6e
topology: v6e:2x2x1
jax: 0.10.0
libtpu: 0.0.40
codegen_flags: <defaults>
</compile_context>

<pallas_src>
import math
import functools

import jax
import jax.numpy as jnp
from jax.experimental import pallas as pl
from jax.experimental.pallas import tpu as pltpu


def _cdiv(a, b):
    return (a + b - 1) // b


def _neuron_kernel(membrane_filter, *refs):
    if membrane_filter:
        (x_ref, prev_v_ref, prev_reset_ref, params_ref,
         spike_ref, v_ref, reset_ref) = refs
    else:
        (x_ref, prev_reset_ref, params_ref,
         spike_ref, v_ref, reset_ref) = refs
        prev_v_ref = None

    f32 = jnp.float32
    x = x_ref[...].astype(f32)                    # [TB, TN]
    prev_reset = prev_reset_ref[...].astype(f32)  # [TB, TN]

    p = params_ref[...].astype(f32)               # [4, TN]
    w = p[0:1, :]                                 # broadcasts over batch (sublanes)
    decay_v = p[1:2, :]
    reset_decay = p[2:3, :]
    reset_v = p[3:4, :]

    weighted_psp = w * x                          # elementwise "dot-product" neuron

    if membrane_filter:
        current_v = prev_v_ref[...].astype(f32) * decay_v + weighted_psp - prev_reset
    else:
        current_v = weighted_psp - prev_reset

    # threshold.forward: max(0, sign(v - 1)) == (v > 1) as {0, 1}
    spike = (current_v > 1.0).astype(f32)
    current_reset = prev_reset * reset_decay + spike * reset_v

    spike_ref[...] = spike.astype(spike_ref.dtype)
    v_ref[...] = current_v.astype(v_ref.dtype)
    reset_ref[...] = current_reset.astype(reset_ref.dtype)


def neuron_cell_dot_product_forward(current_input, prev_v, prev_reset,
                                    weight, decay_v, reset_decay, reset_v,
                                    membrane_filter=True,
                                    tile_b=512, tile_n=1024,
                                    donate_state=False):
    """current_input/prev_v/prev_reset: [B, N]; params: [N] or [1, N].
    Returns (spike, (current_v, current_reset)), each [B, N]."""
    B, N = current_input.shape
    dt = current_input.dtype
    itemsize = jnp.dtype(dt).itemsize

    # sublane packing for the I/O dtype: f32 -> 8, bf16/f16 -> 16, int8 -> 32
    sublane = 8 * max(1, 4 // itemsize)

    # Tile = hardware-aligned block, or the full dim (always a legal block shape).
    # No padding, no output slicing: ragged last blocks are handled by Pallas.
    if N <= tile_n:
        tn = N
    else:
        tn = max(128, (tile_n // 128) * 128)
    if B <= tile_b:
        tb = B
    else:
        tb = max(sublane, (tile_b // sublane) * sublane)

    Nt = _cdiv(N, tn)
    Bt = _cdiv(B, tb)

    # stack the 4 per-neuron parameter rows into one [4, N] f32 array (1 small DMA)
    params = jnp.concatenate([
        jnp.reshape(weight, (1, N)),
        jnp.reshape(decay_v, (1, N)),
        jnp.reshape(reset_decay, (1, N)),
        jnp.reshape(reset_v, (1, N)),
    ], axis=0).astype(jnp.float32)

    if Nt > 1:
        # neuron axis outermost: params block index changes only on the outer
        # loop -> no per-step params re-DMA; also guarantees >=2 tiles on the
        # megacore-sharded (outer) axis for v7x.
        grid = (Nt, Bt)
        tile_spec = pl.BlockSpec((tb, tn), lambda j, i: (i, j))
        param_spec = pl.BlockSpec((4, tn), lambda j, i: (0, j))
    else:
        # single neuron tile: params index is constant regardless; put batch
        # outermost so v7x megacore can split the batch tiles.
        grid = (Bt, Nt)
        tile_spec = pl.BlockSpec((tb, tn), lambda i, j: (i, j))
        param_spec = pl.BlockSpec((4, tn), lambda i, j: (0, j))

    if membrane_filter:
        ins = (current_input, prev_v, prev_reset, params)
        in_specs = [tile_spec, tile_spec, tile_spec, param_spec]
        aliases = {1: 1, 2: 2} if donate_state else {}
    else:
        # prev_v is never read -> do not stream it at all
        ins = (current_input, prev_reset, params)
        in_specs = [tile_spec, tile_spec, param_spec]
        aliases = {1: 2} if donate_state else {}

    # explicit VMEM budget: double-buffered big streams + params, clamped to
    # <= 48 MiB (v7x has 64 MiB physical per TC; v5e/v6e have 128 MiB).
    n_big = (len(ins) - 1) + 3
    vmem_bytes = n_big * 2 * tb * tn * itemsize + 2 * 4 * tn * 4 + (4 << 20)
    vmem_bytes = int(min(max(vmem_bytes, 32 << 20), 48 << 20))

    spike, v, reset = pl.pallas_call(
        functools.partial(_neuron_kernel, membrane_filter),
        out_shape=(jax.ShapeDtypeStruct((B, N), dt),
                   jax.ShapeDtypeStruct((B, N), dt),
                   jax.ShapeDtypeStruct((B, N), dt)),
        grid=grid,
        in_specs=in_specs,
        out_specs=(tile_spec, tile_spec, tile_spec),
        input_output_aliases=aliases,
        compiler_params=pltpu.CompilerParams(
            dimension_semantics=("parallel", "parallel"),
            vmem_limit_bytes=vmem_bytes),
    )(*ins)

    return spike, (v, reset)


def reference_forward(current_input, prev_v, prev_reset,
                      weight, decay_v, reset_decay, reset_v,
                      membrane_filter=True):
    weighted_psp = jnp.reshape(weight, (1, -1)) * current_input
    if membrane_filter:
        current_v = prev_v * decay_v + weighted_psp - prev_reset
    else:
        current_v = weighted_psp - prev_reset
    spike = jnp.maximum(0.0, jnp.sign(current_v - 1.0))
    current_reset = prev_reset * reset_decay + spike * reset_v
    return spike, (current_v, current_reset)


if __name__ == "__main__":
    # small shapes consistent with the module ('axon' => input_size == neuron_number)
    batch_size = 2
    neuron_number = 32
    input_size = neuron_number
    tau_m = 4.0

    key = jax.random.PRNGKey(0)
    k_w, k_x, k_v, k_r = jax.random.split(key, 4)

    # deterministic xavier_uniform-style init for weight [1, neuron_number]
    bound = math.sqrt(6.0 / (1 + neuron_number))
    weight = jax.random.uniform(k_w, (1, neuron_number), jnp.float32,
                                minval=-bound, maxval=bound)
    decay = math.exp(-1.0 / tau_m)
    decay_v = jnp.full((neuron_number,), decay, jnp.float32)
    reset_decay = jnp.full((neuron_number,), decay, jnp.float32)
    reset_v = jnp.full((neuron_number,), 1.0, jnp.float32)

    current_input = jax.random.normal(k_x, (batch_size, input_size), jnp.float32) * 3.0
    prev_v = jax.random.normal(k_v, (batch_size, neuron_number), jnp.float32)
    prev_reset = jax.random.uniform(k_r, (batch_size, neuron_number), jnp.float32)

    ok = True
    for mf in (True, False):
        spike, (cur_v, cur_reset) = neuron_cell_dot_product_forward(
            current_input, prev_v, prev_reset,
            weight, decay_v, reset_decay, reset_v, membrane_filter=mf)
        jax.block_until_ready((spike, cur_v, cur_reset))
        s_ref, (v_ref, r_ref) = reference_forward(
            current_input, prev_v, prev_reset,
            weight, decay_v, reset_decay, reset_v, membrane_filter=mf)
        ok &= bool(jnp.allclose(spike, s_ref, atol=1e-6))
        ok &= bool(jnp.allclose(cur_v, v_ref, atol=1e-6))
        ok &= bool(jnp.allclose(cur_reset, r_ref, atol=1e-6))

    # ragged multi-tile path: partial last blocks in both dims, no padding
    B2, N2 = 20, 300
    x2 = jax.random.normal(k_x, (B2, N2), jnp.float32) * 3.0
    v2 = jax.random.normal(k_v, (B2, N2), jnp.float32)
    r2 = jax.random.uniform(k_r, (B2, N2), jnp.float32)
    w2 = jax.random.uniform(k_w, (1, N2), jnp.float32, minval=-0.4, maxval=0.4)
    dv2 = jnp.full((N2,), decay, jnp.float32)
    rd2 = jnp.full((N2,), decay, jnp.float32)
    rv2 = jnp.full((N2,), 1.0, jnp.float32)
    spike2, (cv2, cr2) = neuron_cell_dot_product_forward(
        x2, v2, r2, w2, dv2, rd2, rv2, membrane_filter=True,
        tile_b=16, tile_n=128)
    jax.block_until_ready((spike2, cv2, cr2))
    s2r, (v2r, r2r) = reference_forward(x2, v2, r2, w2, dv2, rd2, rv2, True)
    ok &= bool(jnp.allclose(spike2, s2r, atol=1e-6))
    ok &= bool(jnp.allclose(cv2, v2r, atol=1e-6))
    ok &= bool(jnp.allclose(cr2, r2r, atol=1e-6))

    if ok:
        print("KERNEL_OK")
    else:
        raise SystemExit("mismatch vs reference")
</pallas_src>

<mosaic_0001>
module attributes {stable_mosaic.version = 11 : i64} {
  func.func @_neuron_kernel(%arg0: i32, %arg1: i32, %arg2: memref<2x32xf32, #tpu.memory_space<vmem>>, %arg3: memref<2x32xf32, #tpu.memory_space<vmem>>, %arg4: memref<2x32xf32, #tpu.memory_space<vmem>>, %arg5: memref<4x32xf32, #tpu.memory_space<vmem>>, %arg6: memref<2x32xf32, #tpu.memory_space<vmem>>, %arg7: memref<2x32xf32, #tpu.memory_space<vmem>>, %arg8: memref<2x32xf32, #tpu.memory_space<vmem>>) attributes {dimension_semantics = [#tpu.dimension_semantics<parallel>, #tpu.dimension_semantics<parallel>], iteration_bounds = array<i64: 1, 1>, scalar_prefetch = 0 : i64, scratch_operands = 0 : i64, tpu.core_type = #tpu.core_type<tc>, window_params = [{transform_indices = @transform_0, window_bounds = array<i64: 2, 32>}, {transform_indices = @transform_1, window_bounds = array<i64: 2, 32>}, {transform_indices = @transform_2, window_bounds = array<i64: 2, 32>}, {transform_indices = @transform_3, window_bounds = array<i64: 4, 32>}, {transform_indices = @transform_4, window_bounds = array<i64: 2, 32>}, {transform_indices = @transform_5, window_bounds = array<i64: 2, 32>}, {transform_indices = @transform_6, window_bounds = array<i64: 2, 32>}]} {
    %c0 = arith.constant 0 : index
    %c0_0 = arith.constant 0 : index
    %0 = vector.load %arg2[%c0, %c0_0] : memref<2x32xf32, #tpu.memory_space<vmem>>, vector<2x32xf32>
    %c0_1 = arith.constant 0 : index
    %c0_2 = arith.constant 0 : index
    %1 = vector.load %arg4[%c0_1, %c0_2] : memref<2x32xf32, #tpu.memory_space<vmem>>, vector<2x32xf32>
    %c0_3 = arith.constant 0 : index
    %c0_4 = arith.constant 0 : index
    %2 = vector.load %arg5[%c0_3, %c0_4] : memref<4x32xf32, #tpu.memory_space<vmem>>, vector<4x32xf32>
    %3 = vector.extract_strided_slice %2 {offsets = [0, 0], sizes = [1, 32], strides = [1, 1]} : vector<4x32xf32> to vector<1x32xf32>
    %4 = vector.extract_strided_slice %2 {offsets = [1, 0], sizes = [1, 32], strides = [1, 1]} : vector<4x32xf32> to vector<1x32xf32>
    %5 = vector.extract_strided_slice %2 {offsets = [2, 0], sizes = [1, 32], strides = [1, 1]} : vector<4x32xf32> to vector<1x32xf32>
    %6 = vector.extract_strided_slice %2 {offsets = [3, 0], sizes = [1, 32], strides = [1, 1]} : vector<4x32xf32> to vector<1x32xf32>
    %7 = vector.broadcast %3 : vector<1x32xf32> to vector<2x32xf32>
    %8 = arith.mulf %7, %0 : vector<2x32xf32>
    %c0_5 = arith.constant 0 : index
    %c0_6 = arith.constant 0 : index
    %9 = vector.load %arg3[%c0_5, %c0_6] : memref<2x32xf32, #tpu.memory_space<vmem>>, vector<2x32xf32>
    %10 = vector.broadcast %4 : vector<1x32xf32> to vector<2x32xf32>
    %11 = arith.mulf %9, %10 : vector<2x32xf32>
    %12 = arith.addf %11, %8 : vector<2x32xf32>
    %13 = arith.subf %12, %1 : vector<2x32xf32>
    %cst = arith.constant 1.000000e+00 : f32
    %14 = vector.broadcast %cst : f32 to vector<2x32xf32>
    %15 = arith.cmpf ogt, %13, %14 : vector<2x32xf32>
    %16 = arith.extui %15 : vector<2x32xi1> to vector<2x32xi32>
    %17 = arith.sitofp %16 : vector<2x32xi32> to vector<2x32xf32>
    %18 = vector.broadcast %5 : vector<1x32xf32> to vector<2x32xf32>
    %19 = arith.mulf %1, %18 : vector<2x32xf32>
    %20 = vector.broadcast %6 : vector<1x32xf32> to vector<2x32xf32>
    %21 = arith.mulf %17, %20 : vector<2x32xf32>
    %22 = arith.addf %19, %21 : vector<2x32xf32>
    %c0_7 = arith.constant 0 : index
    %c0_8 = arith.constant 0 : index
    %23 = vector.load %arg6[%c0_7, %c0_8] : memref<2x32xf32, #tpu.memory_space<vmem>>, vector<2x32xf32>
    tpu.vector_store %arg6[%c0_7, %c0_8], %17 {strides = array<i32>} : memref<2x32xf32, #tpu.memory_space<vmem>>, vector<2x32xf32>,
    %c0_9 = arith.constant 0 : index
    %c0_10 = arith.constant 0 : index
    %24 = vector.load %arg7[%c0_9, %c0_10] : memref<2x32xf32, #tpu.memory_space<vmem>>, vector<2x32xf32>
    tpu.vector_store %arg7[%c0_9, %c0_10], %13 {strides = array<i32>} : memref<2x32xf32, #tpu.memory_space<vmem>>, vector<2x32xf32>,
    %c0_11 = arith.constant 0 : index
    %c0_12 = arith.constant 0 : index
    %25 = vector.load %arg8[%c0_11, %c0_12] : memref<2x32xf32, #tpu.memory_space<vmem>>, vector<2x32xf32>
    tpu.vector_store %arg8[%c0_11, %c0_12], %22 {strides = array<i32>} : memref<2x32xf32, #tpu.memory_space<vmem>>, vector<2x32xf32>,
    return
  }
  func.func @transform_0(%arg0: i32, %arg1: i32) -> (i32, i32) {
    %c0_i32 = arith.constant 0 : i32
    return %arg0, %arg1 : i32, i32
  }
  func.func @transform_1(%arg0: i32, %arg1: i32) -> (i32, i32) {
    %c0_i32 = arith.constant 0 : i32
    return %arg0, %arg1 : i32, i32
  }
  func.func @transform_2(%arg0: i32, %arg1: i32) -> (i32, i32) {
    %c0_i32 = arith.constant 0 : i32
    return %arg0, %arg1 : i32, i32
  }
  func.func @transform_3(%arg0: i32, %arg1: i32) -> (i32, i32) {
    %c0_i32 = arith.constant 0 : i32
    %c0_i32_0 = arith.constant 0 : i32
    return %c0_i32, %arg1 : i32, i32
  }
  func.func @transform_4(%arg0: i32, %arg1: i32) -> (i32, i32) {
    %c0_i32 = arith.constant 0 : i32
    return %arg0, %arg1 : i32, i32
  }
  func.func @transform_5(%arg0: i32, %arg1: i32) -> (i32, i32) {
    %c0_i32 = arith.constant 0 : i32
    return %arg0, %arg1 : i32, i32
  }
  func.func @transform_6(%arg0: i32, %arg1: i32) -> (i32, i32) {
    %c0_i32 = arith.constant 0 : i32
    return %arg0, %arg1 : i32, i32
  }
}

</mosaic_0001>

<bundles_post_ra>
// kernel: tpu_custom_call.1
= control target key start
LH: loop header
LB: loop body
LE: loop exit
PB: predicated region body
PF: predicated region fallthrough
CT: control target
= control target key end

     0   :  { %12 = vsyncpa [#allocation3], 0  ;;  %s336_s0 = inlined_call_operand.hbm [shape: f32[2,32], index: 0, kind: input, shape index: {}]   ;;  %s337_s1 = inlined_call_operand.hbm [shape: f32[2,32], index: 1, kind: input, shape index: {}]   ;;  %s338_s2 = inlined_call_operand.hbm [shape: f32[2,32], index: 2, kind: input, shape index: {}]   ;;  %s339_s3 = inlined_call_operand.vmem [shape: f32[4,32], index: 3, kind: input, shape index: {}]   ;;  %s340_s4 = inlined_call_operand.hbm [shape: f32[2,32], index: 4, kind: output, shape index: {0}]   ;;  %s341_s5 = inlined_call_operand.hbm [shape: f32[2,32], index: 5, kind: output, shape index: {1}]   ;;  %s342_s6 = inlined_call_operand.hbm [shape: f32[2,32], index: 6, kind: output, shape index: {2}]  }
   0x1   :  { %13 = vsyncpa [#allocation6], 0 }
   0x2   :  { %14 = vsyncpa [#allocation4], 0 }
   0x3   :  { %15 = vsyncpa [#allocation10], 0  ;;  %s270_s21 = smov [#allocation5]   ;;  %s271_s23 = smov [#allocation2]  }
   0x4   :  { %s32_s22 = sshll.u32 %s270_s21, 4  ;;  %s22_s24 = sshll.u32 %s271_s23, 4  ;;  %s33_s22 = int_to_ptr.vmem [resolvable:$true] %s32_s22  ;;  %s23_s24 = int_to_ptr.vmem [resolvable:$true] %s22_s24 }
   0x5   :  { %s150_s25 = scalar_lea.vmem %s33_s22, 32  ;;  %p155_p1 = scmp.lt.s32.totalorder %s33_s22, %s33_s22 }
   0x6   :  { %p151_p0 = scmp.ne.s32.totalorder %s33_s22, %s150_s25  ;;  %p156_p2 = scmp.lt.s32.totalorder %s150_s25, %s150_s25 }
   0x8   :  { %p157_p3 = por %p156_p2, %p155_p1 }
   0xa   :  { %p158_p4 = pnand %p157_p3, %p151_p0 }
   0xc   :  { %161 = shalt.err (!%p158_p4)
}
   0xd   :  { %35 = dma.hbm_to_vmem [thread:$0]  %s337_s1, 32, %s33_s22, [#allocation6]  }
   0xe   :  { %s170_s28 = scalar_lea.vmem %s23_s24, 32  ;;  %p175_p6 = scmp.lt.s32.totalorder %s23_s24, %s23_s24 }
   0xf   :  { %p171_p5 = scmp.ne.s32.totalorder %s23_s24, %s170_s28  ;;  %p176_p7 = scmp.lt.s32.totalorder %s170_s28, %s170_s28 }
  0x11   :  { %p177_p8 = por %p176_p7, %p175_p6 }
  0x13   :  { %p178_p9 = pnand %p177_p8, %p171_p5 }
  0x15   :  { %181 = shalt.err (!%p178_p9)
}
  0x16   :  { %25 = dma.hbm_to_vmem [thread:$0]  %s336_s0, 32, %s23_s24, [#allocation3]  }
  0x17   :  { %s272_s7 = smov [#allocation7]  }
  0x18   :  { %s42_s8 = sshll.u32 %s272_s7, 4  ;;  %s43_s8 = int_to_ptr.vmem [resolvable:$true] %s42_s8 }
  0x19   :  { %s190_s9 = scalar_lea.vmem %s43_s8, 32  ;;  %p195_p11 = scmp.lt.s32.totalorder %s43_s8, %s43_s8 }
  0x1a   :  { %p191_p10 = scmp.ne.s32.totalorder %s43_s8, %s190_s9  ;;  %p196_p12 = scmp.lt.s32.totalorder %s190_s9, %s190_s9 }
  0x1c   :  { %p197_p13 = por %p196_p12, %p195_p11 }
  0x1e   :  { %p198_p0 = pnand %p197_p13, %p191_p10 }
  0x20   :  { %201 = shalt.err (!%p198_p0)
}
  0x21   :  { %45 = dma.hbm_to_vmem [thread:$0]  %s338_s2, 32, %s43_s8, [#allocation6]  }
  0x22   :  { %262 = dma.done.wait [#allocation3], 32  }
  0x23   :  { %263 = vsyncadd [#allocation3], 4294967264 }
  0x24   :  { %264 = dma.done.wait [#allocation6], 64  }
  0x25   :  { %265 = vsyncadd [#allocation6], 4294967232  ;;  %v60_v0 = vlaneseq  ;;  %v57_v4 = vld [vmem:[#allocation2] sm:$0x3]  ;;  %v59_v5 = vld [vmem:[%s339_s3] sm:$0xf] }
  0x26   :  { %v65_v7 = vld [vmem:[#allocation5] sm:$0x3]  ;;  %v58_v13 = vld [vmem:[#allocation7] sm:$0x3]  ;;  %s273_s2 = smov [#allocation9]   ;;  %vm87_vm0 = vcmask 254976  }
  0x27   :  { %v61_v1 = vshrl.u32 %v60_v0, 7  ;;  %s107_s12 = sshll.u32 %s273_s2, 4  ;;  %s274_s13 = smov [#allocation8]   ;;  %v276_v19 = vmov 0.0   ;;  %s108_s12 = int_to_ptr.vmem [resolvable:$true] %s107_s12 }
  0x28   :  { %s97_s14 = sshll.u32 %s274_s13, 4  ;;  %s275_s3 = smov [#allocation11]   ;;  %s98_s14 = int_to_ptr.vmem [resolvable:$true] %s97_s14 }
  0x29   :  { %v62_v2 = vsub.s32 0, %v61_v1  ;;  %v68_v3 = vsub.s32 1, %v61_v1  ;;  %v78_v9 = vsub.s32 2, %v61_v1  ;;  %v83_v12 = vsub.s32 3, %v61_v1  ;;  %s117_s15 = sshll.u32 %s275_s3, 4  ;;  %s202_s16 = scalar_lea.vmem %s108_s12, 32  ;;  %s118_s15 = int_to_ptr.vmem [resolvable:$true] %s117_s15 }
  0x2a   :  { %p203_p1 = scmp.ne.s32.totalorder %s108_s12, %s202_s16  ;;  %p207_p2 = scmp.lt.s32.totalorder %s108_s12, %s108_s12 }
  0x2b   :  { %v63_v6 = vrot.slane %v59_v5, %v62_v2  ;;  %v69_v8 = vrot.slane %v59_v5, %v68_v3  ;;  %v79_v15 = vrot.slane %v59_v5, %v78_v9  ;;  %v84_v17 = vrot.slane %v59_v5, %v83_v12  ;;  %p208_p3 = scmp.lt.s32.totalorder %s202_s16, %s202_s16 }
  0x2d   :  { %v64_v10 = vmul.f32 %v63_v6, %v57_v4  ;;  %v70_v11 = vmul.f32 %v69_v8, %v65_v7  ;;  %v80_v18 = vmul.f32 %v79_v15, %v58_v13  ;;  %p209_p4 = por %p208_p3, %p207_p2 }
  0x2f   :  { %v71_v14 = vadd.f32 %v70_v11, %v64_v10  ;;  %p210_p5 = pnand %p209_p4, %p203_p1 }
  0x31   :  { %v72_v16 = vsub.f32 %v71_v14, %v58_v13 }
  0x33   :  { %89 = vst.msk [vmem:[#allocation9] sm:$0x3] %vm87_vm0, %v72_v16  ;;  %vm73_vm1 = vcmp.gt.f32.partialorder %v72_v16, 1.0 }
  0x34   :  { %v134_v20 = vsel %vm73_vm1, 1.0, %v276_v19 }
  0x35   :  { %213 = shalt.err (!%p210_p5)
}
  0x36   :  { %110 = dma.vmem_to_hbm [thread:$0]  %s108_s12, 32, %s341_s5, [#allocation10]   ;;  %v85_v21 = vmul.f32 %v134_v20, %v84_v17  ;;  %88 = vst.msk [vmem:[#allocation8] sm:$0x3] %vm87_vm0, %v134_v20 }
  0x37   :  { %s222_s19 = scalar_lea.vmem %s98_s14, 32  ;;  %p227_p7 = scmp.lt.s32.totalorder %s98_s14, %s98_s14 }
  0x38   :  { %p223_p6 = scmp.ne.s32.totalorder %s98_s14, %s222_s19  ;;  %p228_p8 = scmp.lt.s32.totalorder %s222_s19, %s222_s19 }
  0x3a   :  { %p229_p9 = por %p228_p8, %p227_p7 }
  0x3c   :  { %p230_p10 = pnand %p229_p9, %p223_p6 }
  0x3e   :  { %233 = shalt.err (!%p230_p10)
}
  0x3f   :  { %100 = dma.vmem_to_hbm [thread:$0]  %s98_s14, 32, %s340_s4, [#allocation4]   ;;  %v86_v22 = vadd.f32 %v85_v21, %v80_v18 }
  0x40   :  { %s242_s22 = scalar_lea.vmem %s118_s15, 32  ;;  %p247_p12 = scmp.lt.s32.totalorder %s118_s15, %s118_s15 }
  0x41   :  { %90 = vst.msk [vmem:[#allocation11] sm:$0x3] %vm87_vm0, %v86_v22  ;;  %p243_p11 = scmp.ne.s32.totalorder %s118_s15, %s242_s22  ;;  %p248_p13 = scmp.lt.s32.totalorder %s242_s22, %s242_s22 }
  0x43   :  { %p249_p0 = por %p248_p13, %p247_p12 }
  0x45   :  { %p250_p1 = pnand %p249_p0, %p243_p11 }
  0x47   :  { %253 = shalt.err (!%p250_p1)
}
  0x48   :  { %120 = dma.vmem_to_hbm [thread:$0]  %s118_s15, 32, %s342_s6, [#allocation10]  }
  0x49   :  { %266 = dma.done.wait [#allocation4], 32  }
  0x4a   :  { %267 = vsyncadd [#allocation4], 4294967264 }
  0x4b   :  { %268 = dma.done.wait [#allocation10], 64  }
  0x4c   :  { %269 = vsyncadd [#allocation10], 4294967232 }
  0x4d   :  { %130 = vsyncpa [#allocation3], 1 }
  0x4e   :  { %131 = vsyncpa [#allocation6], 1 }
  0x4f   :  { %132 = vsyncpa [#allocation4], 1 }
  0x50   :  { %133 = vsyncpa [#allocation10], 1 }

</bundles_post_ra>
